<compile_context>
chip_gen: v5e
topology: v5e:2x2
jax: 0.10.0
libtpu: 0.0.40
codegen_flags: <defaults>
</compile_context>

<pallas_src>
import jax
import jax.numpy as jnp
from jax.experimental import pallas as pl
from jax.experimental.pallas import tpu as pltpu


def _round_up(x, m):
    return (x + m - 1) // m * m


def _doc2vec_kernel(ids_ref, table_t_ref, out_ref):
    # ids_ref:     VMEM [S, TB] int32 — rows: doc, context..., target
    #              (context/target ids are pre-offset by L into the combined table)
    # table_t_ref: VMEM [D, K] float32 — transposed combined (lecture ++ word) table
    # out_ref:     VMEM [1, TB] float32 — one dot product per batch element (lane-dense)
    S, TB = ids_ref.shape
    _, K = table_t_ref.shape
    n_avg = S - 1                       # doc + num_words context vectors
    inv = 1.0 / float(n_avg)

    ids = ids_ref[...]                                              # [S, TB] int32
    row = jax.lax.broadcasted_iota(jnp.int32, (K, TB), 0)           # [K, TB]

    # Weighted one-hot selection matrix fusing gather + mean for d_vec.
    sel = jnp.where(row == ids[0:1, :], inv, 0.0)                   # doc row
    for s in range(1, n_avg):                                       # context words
        sel = sel + jnp.where(row == ids[s:s + 1, :], inv, 0.0)
    tgt_sel = jnp.where(row == ids[S - 1:S, :], 1.0, 0.0)           # target row

    # Single MXU pass: both gathers in one [D,K] x [K,2*TB] matmul.
    sel_all = jnp.concatenate([sel, tgt_sel], axis=1)               # [K, 2*TB]
    vecs = jnp.dot(table_t_ref[...], sel_all,
                   preferred_element_type=jnp.float32)              # [D, 2*TB]
    d_vec = vecs[:, :TB]                                            # lane-aligned slice
    t_vec = vecs[:, TB:]

    # Batched dot product over the embedding dim; result stays lane-dense [1, TB].
    out_ref[...] = jnp.sum(d_vec * t_vec, axis=0, keepdims=True)


def doc2vec_forward(inputs, target, lecture_table, word_emb, *, batch_tile=None):
    """inputs: [B, 1+num_words] int, target: [B] int  ->  i_loss [B, 1, 1] f32."""
    B, s_in = inputs.shape
    num_words = s_in - 1
    L, D = lecture_table.shape
    V, D2 = word_emb.shape
    assert D == D2
    S = num_words + 2                                # doc | context... | target

    # Batch tile: multiple of 128 lanes; larger tiles amortize per-step overhead.
    TB = batch_tile or min(512, _round_up(max(B, 1), 128))
    num_tiles = pl.cdiv(B, TB)
    Bp = num_tiles * TB

    # Combined, transposed embedding table [Dp, K]: columns 0..L-1 are lecture
    # rows, columns L..L+V-1 are word rows.  K padded to a lane multiple (128),
    # D padded to a sublane multiple (8).  Zero padding is never selected by
    # the one-hots and adds 0 to the reductions.
    Dp = _round_up(D, 8)
    K = _round_up(L + V, 128)
    table_t = jnp.zeros((Dp, K), jnp.float32)
    table_t = table_t.at[:D, :L].set(lecture_table.astype(jnp.float32).T)
    table_t = table_t.at[:D, L:L + V].set(word_emb.astype(jnp.float32).T)

    # Index slab [S, Bp] int32 with the long batch axis last (lane axis).
    doc = inputs[:, :1].astype(jnp.int32)
    ctx = inputs[:, 1:].astype(jnp.int32) + L
    tgt = target.astype(jnp.int32)[:, None] + L
    ids = jnp.concatenate([doc, ctx, tgt], axis=1).T                # [S, B]
    ids = jnp.pad(ids, ((0, 0), (0, Bp - B)))                       # [S, Bp] (pad -> row 0)

    out = pl.pallas_call(
        _doc2vec_kernel,
        grid=(num_tiles,),
        in_specs=[
            pl.BlockSpec((S, TB), lambda t: (0, t)),
            # Whole table resident in VMEM once; no per-step DMA / double buffer.
            pl.BlockSpec(memory_space=pltpu.MemorySpace.VMEM),
        ],
        out_specs=pl.BlockSpec((1, TB), lambda t: (0, t)),
        out_shape=jax.ShapeDtypeStruct((1, Bp), jnp.float32),
        compiler_params=pltpu.CompilerParams(
            dimension_semantics=("parallel",),
            vmem_limit_bytes=32 * 1024 * 1024,
        ),
    )(ids, table_t)

    return out[0, :B].reshape(B, 1, 1)


if __name__ == "__main__":
    key = jax.random.PRNGKey(0)
    B = 4
    num_words = 2
    lecture_len = 8      # number of documents
    vocab_size = 32      # rows of the (detached) word embedding `model`
    lecture_dim = 128    # embedding dim (lane-aligned)

    k1, k2, k3, k4, k5 = jax.random.split(key, 5)
    lecture_table = jax.random.normal(k1, (lecture_len, lecture_dim), jnp.float32)
    word_emb = jax.random.normal(k2, (vocab_size, lecture_dim), jnp.float32)

    doc_ids = jax.random.randint(k3, (B, 1), 0, lecture_len)
    context = jax.random.randint(k4, (B, num_words), 0, vocab_size)
    inputs = jnp.concatenate([doc_ids, context], axis=1).astype(jnp.int32)
    target = jax.random.randint(k5, (B,), 0, vocab_size).astype(jnp.int32)

    i_loss = doc2vec_forward(inputs, target, lecture_table, word_emb)
    i_loss = jax.block_until_ready(i_loss)

    # Pure-JAX reference of the PyTorch forward.
    lec_vec = lecture_table[inputs[:, 0]][:, None, :]            # [B, 1, D]
    word_vec = word_emb[inputs[:, 1:]]                           # [B, W, D]
    target_vec = word_emb[target][:, None, :]                    # [B, 1, D]
    d_vec = jnp.concatenate([lec_vec, word_vec], 1).mean(axis=1, keepdims=True)
    ref = jnp.einsum("bij,bkj->bik", d_vec, target_vec)          # [B, 1, 1]

    assert i_loss.shape == (B, 1, 1), i_loss.shape
    assert jnp.allclose(i_loss, ref, atol=1e-4, rtol=1e-4), (i_loss, ref)
    # TODO(synk): the PyTorch module only prints i_loss and returns None; the
    # kernel returns it instead so correctness can be asserted.
    print("KERNEL_OK")
</pallas_src>

<mosaic_0001>
module attributes {stable_mosaic.version = 11 : i64} {
  func.func @_doc2vec_kernel(%arg0: i32, %arg1: memref<4x128xi32, #tpu.memory_space<vmem>>, %arg2: memref<128x128xf32, #tpu.memory_space<vmem>>, %arg3: memref<1x128xf32, #tpu.memory_space<vmem>>) attributes {dimension_semantics = [#tpu.dimension_semantics<parallel>], iteration_bounds = array<i64: 1>, scalar_prefetch = 0 : i64, scratch_operands = 0 : i64, tpu.core_type = #tpu.core_type<tc>, window_params = [{transform_indices = @transform_0, window_bounds = array<i64: 4, 128>}, {pipeline_mode = #tpu.pipeline_mode<synchronous>, transform_indices = @transform_1, window_bounds = array<i64: 128, 128>}, {transform_indices = @transform_2, window_bounds = array<i64: 1, 128>}]} {
    %c0 = arith.constant 0 : index
    %c0_0 = arith.constant 0 : index
    %0 = vector.load %arg1[%c0, %c0_0] : memref<4x128xi32, #tpu.memory_space<vmem>>, vector<4x128xi32>
    %1 = tpu.iota {dimensions = array<i32: 0>} : vector<128x128xi32>
    %2 = vector.extract_strided_slice %0 {offsets = [0, 0], sizes = [1, 128], strides = [1, 1]} : vector<4x128xi32> to vector<1x128xi32>
    %3 = vector.broadcast %2 : vector<1x128xi32> to vector<128x128xi32>
    %4 = arith.cmpi eq, %1, %3 : vector<128x128xi32>
    %cst = arith.constant 0.333333343 : f32
    %cst_1 = arith.constant 0.000000e+00 : f32
    %5 = vector.broadcast %cst : f32 to vector<128x128xf32>
    %6 = vector.broadcast %cst_1 : f32 to vector<128x128xf32>
    %7 = arith.select %4, %5, %6 : vector<128x128xi1>, vector<128x128xf32>
    %8 = vector.extract_strided_slice %0 {offsets = [1, 0], sizes = [1, 128], strides = [1, 1]} : vector<4x128xi32> to vector<1x128xi32>
    %9 = vector.broadcast %8 : vector<1x128xi32> to vector<128x128xi32>
    %10 = arith.cmpi eq, %1, %9 : vector<128x128xi32>
    %cst_2 = arith.constant 0.333333343 : f32
    %cst_3 = arith.constant 0.000000e+00 : f32
    %11 = vector.broadcast %cst_2 : f32 to vector<128x128xf32>
    %12 = vector.broadcast %cst_3 : f32 to vector<128x128xf32>
    %13 = arith.select %10, %11, %12 : vector<128x128xi1>, vector<128x128xf32>
    %14 = arith.addf %7, %13 : vector<128x128xf32>
    %15 = vector.extract_strided_slice %0 {offsets = [2, 0], sizes = [1, 128], strides = [1, 1]} : vector<4x128xi32> to vector<1x128xi32>
    %16 = vector.broadcast %15 : vector<1x128xi32> to vector<128x128xi32>
    %17 = arith.cmpi eq, %1, %16 : vector<128x128xi32>
    %cst_4 = arith.constant 0.333333343 : f32
    %cst_5 = arith.constant 0.000000e+00 : f32
    %18 = vector.broadcast %cst_4 : f32 to vector<128x128xf32>
    %19 = vector.broadcast %cst_5 : f32 to vector<128x128xf32>
    %20 = arith.select %17, %18, %19 : vector<128x128xi1>, vector<128x128xf32>
    %21 = arith.addf %14, %20 : vector<128x128xf32>
    %22 = vector.extract_strided_slice %0 {offsets = [3, 0], sizes = [1, 128], strides = [1, 1]} : vector<4x128xi32> to vector<1x128xi32>
    %23 = vector.broadcast %22 : vector<1x128xi32> to vector<128x128xi32>
    %24 = arith.cmpi eq, %1, %23 : vector<128x128xi32>
    %cst_6 = arith.constant 1.000000e+00 : f32
    %cst_7 = arith.constant 0.000000e+00 : f32
    %25 = vector.broadcast %cst_6 : f32 to vector<128x128xf32>
    %26 = vector.broadcast %cst_7 : f32 to vector<128x128xf32>
    %27 = arith.select %24, %25, %26 : vector<128x128xi1>, vector<128x128xf32>
    %28 = tpu.concatenate %21, %27 in 1 : vector<128x128xf32>, vector<128x128xf32> -> vector<128x256xf32>
    %c0_8 = arith.constant 0 : index
    %c0_9 = arith.constant 0 : index
    %29 = vector.load %arg2[%c0_8, %c0_9] : memref<128x128xf32, #tpu.memory_space<vmem>>, vector<128x128xf32>
    %cst_10 = arith.constant dense<0.000000e+00> : vector<128x256xf32>
    %30 = tpu.matmul %29, %28, %cst_10 {dimension_numbers = #tpu.dot_dimension_numbers<[1], [0], [0], [1], [0, 0, 1, 1], [], []>} : vector<128x128xf32>, vector<128x256xf32>, vector<128x256xf32> -> vector<128x256xf32>
    %31 = vector.extract_strided_slice %30 {offsets = [0, 0], sizes = [128, 128], strides = [1, 1]} : vector<128x256xf32> to vector<128x128xf32>
    %32 = vector.extract_strided_slice %30 {offsets = [0, 128], sizes = [128, 128], strides = [1, 1]} : vector<128x256xf32> to vector<128x128xf32>
    %33 = arith.mulf %31, %32 : vector<128x128xf32>
    %cst_11 = arith.constant dense<0.000000e+00> : vector<128xf32>
    %34 = vector.multi_reduction <add>, %33, %cst_11 [0] : vector<128x128xf32> to vector<128xf32>
    %35 = vector.shape_cast %34 : vector<128xf32> to vector<1x128xf32>
    %c0_12 = arith.constant 0 : index
    %c0_13 = arith.constant 0 : index
    %36 = vector.load %arg3[%c0_12, %c0_13] : memref<1x128xf32, #tpu.memory_space<vmem>>, vector<1x128xf32>
    tpu.vector_store %arg3[%c0_12, %c0_13], %35 {strides = array<i32>} : memref<1x128xf32, #tpu.memory_space<vmem>>, vector<1x128xf32>,
    return
  }
  func.func @transform_0(%arg0: i32) -> (i32, i32) {
    %c0_i32 = arith.constant 0 : i32
    %c0_i32_0 = arith.constant 0 : i32
    return %c0_i32, %arg0 : i32, i32
  }
  func.func @transform_1(%arg0: i32) -> (i32, i32) {
    %c0_i32 = arith.constant 0 : i32
    %c0_i32_0 = arith.constant 0 : i32
    %c0_i32_1 = arith.constant 0 : i32
    return %c0_i32, %c0_i32_0 : i32, i32
  }
  func.func @transform_2(%arg0: i32) -> (i32, i32) {
    %c0_i32 = arith.constant 0 : i32
    %c0_i32_0 = arith.constant 0 : i32
    return %c0_i32, %arg0 : i32, i32
  }
}

</mosaic_0001>

<bundles_post_ra>
// kernel: tpu_custom_call.1
= control target key start
LH: loop header
LB: loop body
LE: loop exit
PB: predicated region body
PF: predicated region fallthrough
CT: control target
= control target key end

     0   :  { %7 = vsyncpa [#allocation3], 0  ;;  %s925_s0 = inlined_call_operand.hbm [shape: s32[4,128], index: 0, kind: input, shape index: {}]   ;;  %s926_s1 = inlined_call_operand.hbm [shape: f32[128,128], index: 1, kind: input, shape index: {}]   ;;  %s927_s2 = inlined_call_operand.hbm [shape: f32[1,128], index: 2, kind: output, shape index: {}]  }
   0x1   :  { %8 = vsyncpa [#allocation6], 0 }
   0x2   :  { %9 = vsyncpa [#allocation4], 0  ;;  %s15_s11 = sshll.u32 %s925_s0, 4  ;;  %s559_s12 = smov [#allocation2]   ;;  %s16_s11 = int_to_ptr.hbm [resolvable:$true] %s15_s11 }
   0x3   :  { %s17_s13 = sshll.u32 %s559_s12, 4  ;;  %s25_s16 = sshll.u32 %s926_s1, 4  ;;  %s18_s13 = int_to_ptr.vmem [resolvable:$true] %s17_s13  ;;  %s26_s16 = int_to_ptr.hbm [resolvable:$true] %s25_s16 }
   0x4   :  { %20 = dma.hbm_to_vmem [thread:$0]  %s16_s11, 64, %s18_s13, [#allocation3]  }
   0x5   :  { %s560_s17 = smov [#allocation5]   ;;  %s561_s19 = smov 128  }
   0x6   :  { %s27_s18 = sshll.u32 %s560_s17, 4  ;;  %s562_s20 = smov 8   ;;  %s28_s18 = int_to_ptr.vmem [resolvable:$true] %s27_s18 }
   0x7   :  { %33 = dma.hbm_to_vmem [thread:$0]  %s26_s16, 2048, %s28_s18, [#allocation6], %s561_s19, %s561_s19, %s562_s20  }
   0x8   :  { %553 = dma.done.wait [#allocation3], 64  }
   0x9   :  { %554 = vsyncadd [#allocation3], 4294967232 }
   0xa   :  { %555 = dma.done.wait [#allocation6], 2048  }
   0xb   :  { %556 = vsyncadd [#allocation6], 4294965248  ;;  %v43_v0 = vlaneseq  ;;  %v42_v9 = vld [vmem:[#allocation2] sm:$0xf]  ;;  %v563_v22 = vmov 0.0   ;;  %v564_v26 = vmov 1.0  }
   0xc   :  { %v618_v14 = vperm.slane %v42_v9, 0  ;;  %v620_v15 = vperm.slane %v42_v9, 1  ;;  %v622_v16 = vperm.slane %v42_v9, 2  ;;  %v624_v17 = vperm.slane %v42_v9, 3  ;;  %s565_s0 = smov [#allocation7]   ;;  %s415_s23 = sshll.u32 %s927_s2, 4  ;;  %s416_s23 = int_to_ptr.hbm [resolvable:$true] %s415_s23 }
   0xd   :  { %v587_v1 = vshrl.u32 %v43_v0, 7  ;;  %s413_s1 = sshll.u32 %s565_s0, 4  ;;  %s414_s1 = int_to_ptr.vmem [resolvable:$true] %s413_s1 }
   0xf   :  { %v59_v2 = vadd.s32 120, %v587_v1  ;;  %v58_v3 = vadd.s32 112, %v587_v1  ;;  %v592_v4 = vadd.s32 104, %v587_v1  ;;  %v595_v5 = vadd.s32 96, %v587_v1 }
  0x10   :  { %v598_v6 = vadd.s32 88, %v587_v1  ;;  %v601_v7 = vadd.s32 80, %v587_v1  ;;  %v604_v8 = vadd.s32 72, %v587_v1  ;;  %v607_v10 = vadd.s32 64, %v587_v1 }
  0x11   :  { %v610_v11 = vadd.s32 56, %v587_v1  ;;  %v613_v12 = vadd.s32 48, %v587_v1  ;;  %v616_v13 = vadd.s32 40, %v587_v1  ;;  %v627_v18 = vadd.s32 32, %v587_v1 }
  0x12   :  { %v630_v19 = vadd.s32 24, %v587_v1  ;;  %v633_v20 = vadd.s32 16, %v587_v1  ;;  %v636_v21 = vadd.s32 8, %v587_v1  ;;  %vm76_vm0 = vcmp.eq.s32.totalorder %v59_v2, %v618_v14 }
  0x13   :  { %vm109_vm1 = vcmp.eq.s32.totalorder %v59_v2, %v620_v15  ;;  %vm158_vm2 = vcmp.eq.s32.totalorder %v59_v2, %v622_v16  ;;  %vm207_vm3 = vcmp.eq.s32.totalorder %v59_v2, %v624_v17  ;;  %v92_v23 = vsel %vm76_vm0, 0.33333334, %v563_v22 }
  0x14   :  { %v125_v24 = vsel %vm109_vm1, 0.33333334, %v563_v22  ;;  %v174_v25 = vsel %vm158_vm2, 0.33333334, %v563_v22  ;;  %426 = vmatpush.msk.msra.mxu1 %vm207_vm3, %v564_v26  ;;  %vm75_vm4 = vcmp.eq.s32.totalorder %v58_v3, %v618_v14  ;;  %458 = vmatpush.msk.msra.mxu3 %vm207_vm3, %v564_v26  ;;  %vm108_vm5 = vcmp.eq.s32.totalorder %v58_v3, %v620_v15 }
  0x15   :  { %v141_v27 = vadd.f32 %v125_v24, %v92_v23  ;;  %v91_v28 = vsel %vm75_vm4, 0.33333334, %v563_v22  ;;  %vm157_vm6 = vcmp.eq.s32.totalorder %v58_v3, %v622_v16  ;;  %v124_v29 = vsel %vm108_vm5, 0.33333334, %v563_v22 }
  0x16   :  { %v173_v30 = vsel %vm157_vm6, 0.33333334, %v563_v22  ;;  %vm206_vm7 = vcmp.eq.s32.totalorder %v58_v3, %v624_v17  ;;  %vm74_vm8 = vcmp.eq.s32.totalorder %v592_v4, %v618_v14  ;;  %v140_v32 = vadd.f32 %v124_v29, %v91_v28 }
  0x17   :  { %v190_v31 = vadd.f32 %v174_v25, %v141_v27  ;;  %427 = vmatpush.msk.msra.mxu1 %vm206_vm7, %v564_v26  ;;  %v90_v33 = vsel %vm74_vm8, 0.33333334, %v563_v22  ;;  %vm107_vm9 = vcmp.eq.s32.totalorder %v592_v4, %v620_v15  ;;  %459 = vmatpush.msk.msra.mxu3 %vm206_vm7, %v564_v26  ;;  %vm156_vm10 = vcmp.eq.s32.totalorder %v592_v4, %v622_v16 }
  0x18   :  { %v123_v34 = vsel %vm107_vm9, 0.33333334, %v563_v22  ;;  %vm205_vm11 = vcmp.eq.s32.totalorder %v592_v4, %v624_v17  ;;  %vm73_vm12 = vcmp.eq.s32.totalorder %v595_v5, %v618_v14  ;;  %v189_v35 = vadd.f32 %v173_v30, %v140_v32 }
  0x19   :  { %240 = vmatpush.msra.mxu0 %v190_v31  ;;  %v139_v36 = vadd.f32 %v123_v34, %v90_v33  ;;  %v172_v37 = vsel %vm156_vm10, 0.33333334, %v563_v22  ;;  %428 = vmatpush.msk.msra.mxu1 %vm205_vm11, %v564_v26  ;;  %v89_v38 = vsel %vm73_vm12, 0.33333334, %v563_v22  ;;  %vm106_vm13 = vcmp.eq.s32.totalorder %v595_v5, %v620_v15 }
  0x1a   :  { %vm155_vm14 = vcmp.eq.s32.totalorder %v595_v5, %v622_v16  ;;  %vm204_vm15 = vcmp.eq.s32.totalorder %v595_v5, %v624_v17  ;;  %vm72_vm0 = vcmp.eq.s32.totalorder %v598_v6, %v618_v14  ;;  %442 = vmatpush.msra.mxu2 %v190_v31  ;;  %v122_v40 = vsel %vm106_vm13, 0.33333334, %v563_v22  ;;  %460 = vmatpush.msk.msra.mxu3 %vm205_vm11, %v564_v26 }
  0x1b   :  { %241 = vmatpush.msra.mxu0 %v189_v35  ;;  %v188_v39 = vadd.f32 %v172_v37, %v139_v36  ;;  %v171_v41 = vsel %vm155_vm14, 0.33333334, %v563_v22  ;;  %429 = vmatpush.msk.msra.mxu1 %vm204_vm15, %v564_v26  ;;  %v88_v42 = vsel %vm72_vm0, 0.33333334, %v563_v22  ;;  %v138_v43 = vadd.f32 %v122_v40, %v89_v38 }
  0x1c   :  { %vm105_vm1 = vcmp.eq.s32.totalorder %v598_v6, %v620_v15  ;;  %vm154_vm2 = vcmp.eq.s32.totalorder %v598_v6, %v622_v16  ;;  %vm203_vm3 = vcmp.eq.s32.totalorder %v598_v6, %v624_v17  ;;  %443 = vmatpush.msra.mxu2 %v189_v35  ;;  %vm71_vm4 = vcmp.eq.s32.totalorder %v601_v7, %v618_v14 }
  0x1d   :  { %242 = vmatpush.msra.mxu0 %v188_v39  ;;  %v121_v44 = vsel %vm105_vm1, 0.33333334, %v563_v22  ;;  %v170_v45 = vsel %vm154_vm2, 0.33333334, %v563_v22  ;;  %430 = vmatpush.msk.msra.mxu1 %vm203_vm3, %v564_v26  ;;  %vm104_vm5 = vcmp.eq.s32.totalorder %v601_v7, %v620_v15  ;;  %v187_v46 = vadd.f32 %v171_v41, %v138_v43 }
  0x1e   :  { %v137_v47 = vadd.f32 %v121_v44, %v88_v42  ;;  %v87_v48 = vsel %vm71_vm4, 0.33333334, %v563_v22  ;;  %v120_v49 = vsel %vm104_vm5, 0.33333334, %v563_v22  ;;  %444 = vmatpush.msra.mxu2 %v188_v39  ;;  %vm153_vm6 = vcmp.eq.s32.totalorder %v601_v7, %v622_v16  ;;  %461 = vmatpush.msk.msra.mxu3 %vm204_vm15, %v564_v26 }
  0x1f   :  { %v136_v50 = vadd.f32 %v120_v49, %v87_v48  ;;  %vm202_vm7 = vcmp.eq.s32.totalorder %v601_v7, %v624_v17  ;;  %vm70_vm8 = vcmp.eq.s32.totalorder %v604_v8, %v618_v14  ;;  %243 = vmatpush.msra.mxu0 %v187_v46  ;;  %v169_v52 = vsel %vm153_vm6, 0.33333334, %v563_v22  ;;  %v234_v49 = vld [vmem:[#allocation5 + $0x50] sm:$0xff] }
  0x20   :  { %v186_v51 = vadd.f32 %v170_v45, %v137_v47  ;;  %431 = vmatpush.msk.msra.mxu1 %vm202_vm7, %v564_v26  ;;  %v86_v53 = vsel %vm70_vm8, 0.33333334, %v563_v22  ;;  %vm103_vm9 = vcmp.eq.s32.totalorder %v604_v8, %v620_v15  ;;  %vm152_vm10 = vcmp.eq.s32.totalorder %v604_v8, %v622_v16  ;;  %445 = vmatpush.msra.mxu2 %v187_v46  ;;  %v224_v46 = vld [vmem:[#allocation5] sm:$0xff] }
  0x21   :  { %v185_v54 = vadd.f32 %v169_v52, %v136_v50  ;;  %v119_v55 = vsel %vm103_vm9, 0.33333334, %v563_v22  ;;  %vm201_vm11 = vcmp.eq.s32.totalorder %v604_v8, %v624_v17  ;;  %v168_v57 = vsel %vm152_vm10, 0.33333334, %v563_v22  ;;  %462 = vmatpush.msk.msra.mxu3 %vm203_vm3, %v564_v26  ;;  %v235_v50 = vld [vmem:[#allocation5 + $0x58] sm:$0xff]  ;;  %v230_v52 = vld [vmem:[#allocation5 + $0x30] sm:$0xff] }
  0x22   :  { %244 = vmatpush.msra.mxu0 %v186_v51  ;;  %v135_v56 = vadd.f32 %v119_v55, %v86_v53  ;;  %432 = vmatpush.msk.msra.mxu1 %vm201_vm11, %v564_v26  ;;  %vm69_vm12 = vcmp.eq.s32.totalorder %v607_v10, %v618_v14  ;;  %vm102_vm13 = vcmp.eq.s32.totalorder %v607_v10, %v620_v15  ;;  %v238_v53 = vld [vmem:[#allocation5 + $0x70] sm:$0xff]  ;;  %v239_v55 = vld [vmem:[#allocation5 + $0x78] sm:$0xff] }
  0x23   :  { %v85_v58 = vsel %vm69_vm12, 0.33333334, %v563_v22  ;;  %v118_v59 = vsel %vm102_vm13, 0.33333334, %v563_v22  ;;  %vm151_vm14 = vcmp.eq.s32.totalorder %v607_v10, %v622_v16  ;;  %vm200_vm15 = vcmp.eq.s32.totalorder %v607_v10, %v624_v17  ;;  %446 = vmatpush.msra.mxu2 %v186_v51  ;;  %463 = vmatpush.msk.msra.mxu3 %vm202_vm7, %v564_v26  ;;  %v228_v51 = vld [vmem:[#allocation5 + $0x20] sm:$0xff] }
  0x24   :  { %245 = vmatpush.msra.mxu0 %v185_v54  ;;  %v184_v60 = vadd.f32 %v168_v57, %v135_v56  ;;  %v134_v61 = vadd.f32 %v118_v59, %v85_v58  ;;  %v167_v62 = vsel %vm151_vm14, 0.33333334, %v563_v22  ;;  %433 = vmatpush.msk.msra.mxu1 %vm200_vm15, %v564_v26  ;;  %vm68_vm0 = vcmp.eq.s32.totalorder %v610_v11, %v618_v14 }
  0x25   :  { %v84_v63 = vsel %vm68_vm0, 0.33333334, %v563_v22  ;;  %vm101_vm1 = vcmp.eq.s32.totalorder %v610_v11, %v620_v15  ;;  %vm150_vm2 = vcmp.eq.s32.totalorder %v610_v11, %v622_v16  ;;  %vm199_vm3 = vcmp.eq.s32.totalorder %v610_v11, %v624_v17  ;;  %447 = vmatpush.msra.mxu2 %v185_v54  ;;  %464 = vmatpush.msk.msra.mxu3 %vm201_vm11, %v564_v26  ;;  %v231_v54 = vld [vmem:[#allocation5 + $0x38] sm:$0xff] }
  0x26   :  { %246 = vmatpush.msra.mxu0 %v184_v60  ;;  %v183_v0 = vadd.f32 %v167_v62, %v134_v61  ;;  %v117_v2 = vsel %vm101_vm1, 0.33333334, %v563_v22  ;;  %v166_v3 = vsel %vm150_vm2, 0.33333334, %v563_v22  ;;  %434 = vmatpush.msk.msra.mxu1 %vm199_vm3, %v564_v26  ;;  %vm67_vm4 = vcmp.eq.s32.totalorder %v613_v12, %v618_v14 }
  0x27   :  { %v133_v4 = vadd.f32 %v117_v2, %v84_v63  ;;  %v83_v5 = vsel %vm67_vm4, 0.33333334, %v563_v22  ;;  %vm100_vm5 = vcmp.eq.s32.totalorder %v613_v12, %v620_v15  ;;  %vm149_vm6 = vcmp.eq.s32.totalorder %v613_v12, %v622_v16  ;;  %448 = vmatpush.msra.mxu2 %v184_v60  ;;  %465 = vmatpush.msk.msra.mxu3 %vm200_vm15, %v564_v26 }
  0x28   :  { %247 = vmatpush.msra.mxu0 %v183_v0  ;;  %v116_v6 = vsel %vm100_vm5, 0.33333334, %v563_v22  ;;  %v165_v7 = vsel %vm149_vm6, 0.33333334, %v563_v22  ;;  %vm198_vm7 = vcmp.eq.s32.totalorder %v613_v12, %v624_v17  ;;  %vm66_vm8 = vcmp.eq.s32.totalorder %v616_v13, %v618_v14 }
  0x29   :  { %v182_v9 = vadd.f32 %v166_v3, %v133_v4  ;;  %v132_v23 = vadd.f32 %v116_v6, %v83_v5  ;;  %435 = vmatpush.msk.msra.mxu1 %vm198_vm7, %v564_v26  ;;  %v82_v8 = vsel %vm66_vm8, 0.33333334, %v563_v22  ;;  %vm99_vm9 = vcmp.eq.s32.totalorder %v616_v13, %v620_v15  ;;  %449 = vmatpush.msra.mxu2 %v183_v0 }
  0x2a   :  { %v115_v24 = vsel %vm99_vm9, 0.33333334, %v563_v22  ;;  %vm148_vm10 = vcmp.eq.s32.totalorder %v616_v13, %v622_v16  ;;  %vm197_vm11 = vcmp.eq.s32.totalorder %v616_v13, %v624_v17  ;;  %vm65_vm12 = vcmp.eq.s32.totalorder %v627_v18, %v618_v14  ;;  %466 = vmatpush.msk.msra.mxu3 %vm199_vm3, %v564_v26 }
  0x2b   :  { %248 = vmatpush.msra.mxu0 %v182_v9  ;;  %v181_v25 = vadd.f32 %v165_v7, %v132_v23  ;;  %v131_v27 = vadd.f32 %v115_v24, %v82_v8  ;;  %v164_v28 = vsel %vm148_vm10, 0.33333334, %v563_v22  ;;  %436 = vmatpush.msk.msra.mxu1 %vm197_vm11, %v564_v26  ;;  %v81_v29 = vsel %vm65_vm12, 0.33333334, %v563_v22 }
  0x2c   :  { %vm98_vm13 = vcmp.eq.s32.totalorder %v627_v18, %v620_v15  ;;  %vm147_vm14 = vcmp.eq.s32.totalorder %v627_v18, %v622_v16  ;;  %vm196_vm15 = vcmp.eq.s32.totalorder %v627_v18, %v624_v17  ;;  %vm64_vm0 = vcmp.eq.s32.totalorder %v630_v19, %v618_v14  ;;  %450 = vmatpush.msra.mxu2 %v182_v9  ;;  %v232_v18 = vld [vmem:[#allocation5 + $0x40] sm:$0xff] }
  0x2d   :  { %249 = vmatpush.msra.mxu0 %v181_v25  ;;  %v180_v10 = vadd.f32 %v164_v28, %v131_v27  ;;  %v114_v30 = vsel %vm98_vm13, 0.33333334, %v563_v22  ;;  %v163_v31 = vsel %vm147_vm14, 0.33333334, %v563_v22  ;;  %437 = vmatpush.msk.msra.mxu1 %vm196_vm15, %v564_v26  ;;  %v80_v32 = vsel %vm64_vm0, 0.33333334, %v563_v22 }
  0x2e   :  { %v130_v33 = vadd.f32 %v114_v30, %v81_v29  ;;  %vm97_vm1 = vcmp.eq.s32.totalorder %v630_v19, %v620_v15  ;;  %vm146_vm2 = vcmp.eq.s32.totalorder %v630_v19, %v622_v16  ;;  %vm195_vm4 = vcmp.eq.s32.totalorder %v630_v19, %v624_v17  ;;  %451 = vmatpush.msra.mxu2 %v181_v25  ;;  %v233_v19 = vld [vmem:[#allocation5 + $0x48] sm:$0xff] }
  0x2f   :  { %250 = vmatpush.msra.mxu0 %v180_v10  ;;  %v113_v34 = vsel %vm97_vm1, 0.33333334, %v563_v22  ;;  %v162_v35 = vsel %vm146_vm2, 0.33333334, %v563_v22  ;;  %438 = vmatpush.msk.msra.mxu1 %vm195_vm4, %v564_v26  ;;  %vm63_vm5 = vcmp.eq.s32.totalorder %v633_v20, %v618_v14  ;;  %vm96_vm6 = vcmp.eq.s32.totalorder %v633_v20, %v620_v15 }
  0x30   :  { %v179_v36 = vadd.f32 %v163_v31, %v130_v33  ;;  %v129_v37 = vadd.f32 %v113_v34, %v80_v32  ;;  %v79_v11 = vsel %vm63_vm5, 0.33333334, %v563_v22  ;;  %v112_v38 = vsel %vm96_vm6, 0.33333334, %v563_v22  ;;  %467 = vmatpush.msk.msra.mxu3 %vm198_vm7, %v564_v26  ;;  %452 = vmatpush.msra.mxu2 %v180_v10 }
  0x31   :  { %v128_v39 = vadd.f32 %v112_v38, %v79_v11  ;;  %vm145_vm3 = vcmp.eq.s32.totalorder %v633_v20, %v622_v16  ;;  %vm194_vm8 = vcmp.eq.s32.totalorder %v633_v20, %v624_v17  ;;  %vm62_vm9 = vcmp.eq.s32.totalorder %v636_v21, %v618_v14  ;;  %v226_v20 = vld [vmem:[#allocation5 + $0x10] sm:$0xff] }
  0x32   :  { %251 = vmatpush.msra.mxu0 %v179_v36  ;;  %v178_v40 = vadd.f32 %v162_v35, %v129_v37  ;;  %v161_v41 = vsel %vm145_vm3, 0.33333334, %v563_v22  ;;  %439 = vmatpush.msk.msra.mxu1 %vm194_vm8, %v564_v26  ;;  %v78_v12 = vsel %vm62_vm9, 0.33333334, %v563_v22  ;;  %vm95_vm7 = vcmp.eq.s32.totalorder %v636_v21, %v620_v15 }
  0x33   :  { %v177_v42 = vadd.f32 %v161_v41, %v128_v39  ;;  %v111_v43 = vsel %vm95_vm7, 0.33333334, %v563_v22  ;;  %vm144_vm10 = vcmp.eq.s32.totalorder %v636_v21, %v622_v16  ;;  %vm193_vm12 = vcmp.eq.s32.totalorder %v636_v21, %v624_v17  ;;  %468 = vmatpush.msk.msra.mxu3 %vm197_vm11, %v564_v26  ;;  %453 = vmatpush.msra.mxu2 %v179_v36  ;;  %v227_v21 = vld [vmem:[#allocation5 + $0x18] sm:$0xff] }
  0x34   :  { %252 = vmatpush.msra.mxu0 %v178_v40  ;;  %v127_v44 = vadd.f32 %v111_v43, %v78_v12  ;;  %v160_v45 = vsel %vm144_vm10, 0.33333334, %v563_v22  ;;  %440 = vmatpush.msk.msra.mxu1 %vm193_vm12, %v564_v26  ;;  %vm61_vm13 = vcmp.eq.s32.totalorder %v587_v1, %v618_v14  ;;  %vm94_vm14 = vcmp.eq.s32.totalorder %v587_v1, %v620_v15 }
  0x35   :  { %v77_v47 = vsel %vm61_vm13, 0.33333334, %v563_v22  ;;  %v110_v13 = vsel %vm94_vm14, 0.33333334, %v563_v22  ;;  %vm143_vm11 = vcmp.eq.s32.totalorder %v587_v1, %v622_v16  ;;  %vm192_vm0 = vcmp.eq.s32.totalorder %v587_v1, %v624_v17  ;;  %469 = vmatpush.msk.msra.mxu3 %vm196_vm15, %v564_v26  ;;  %454 = vmatpush.msra.mxu2 %v178_v40  ;;  %v236_v1 = vld [vmem:[#allocation5 + $0x60] sm:$0xff]  ;;  %v229_v17 = vld [vmem:[#allocation5 + $0x28] sm:$0xff] }
  0x36   :  { %253 = vmatpush.msra.mxu0 %v177_v42  ;;  %v176_v14 = vadd.f32 %v160_v45, %v127_v44  ;;  %v126_v15 = vadd.f32 %v110_v13, %v77_v47  ;;  %v159_v48 = vsel %vm143_vm11, 0.33333334, %v563_v22  ;;  %441 = vmatpush.msk.msra.mxu1 %vm192_vm0, %v564_v26  ;;  %v225_v22 = vld [vmem:[#allocation5 + $0x8] sm:$0xff] }
  0x37   :  { %321 = vmatmul.f32.vlgmr.msra.gmra.mxu1 %v224_v46  ;;  %470 = vmatpush.msk.msra.mxu3 %vm195_vm4, %v564_v26 }
  0x38   :  { %254 = vmatpush.msra.mxu0 %v176_v14  ;;  %v175_v16 = vadd.f32 %v159_v48, %v126_v15  ;;  %455 = vmatpush.msra.mxu2 %v177_v42 }
  0x39   :  { %471 = vmatpush.msk.msra.mxu3 %vm194_vm8, %v564_v26 }
  0x3a   :  { %255 = vmatpush.msra.mxu0 %v175_v16  ;;  %456 = vmatpush.msra.mxu2 %v176_v14 }
  0x3b   :  { %256 = vmatmul.f32.vlgmr.msra.gmra.mxu0 %v224_v46  ;;  %472 = vmatpush.msk.msra.mxu3 %vm193_vm12, %v564_v26 }
  0x3c   :  { %457 = vmatpush.msra.mxu2 %v175_v16 }
  0x3d   :  { %473 = vmatpush.msk.msra.mxu3 %vm192_vm0, %v564_v26  ;;  %280 = vmatmul.f32.vlgmr.msra.gmra.mxu2 %v232_v18  ;;  %v237_v26 = vld [vmem:[#allocation5 + $0x68] sm:$0xff] }
  0x3e   :  { %345 = vmatmul.f32.vlgmr.msra.gmra.mxu3 %v232_v18 }
  0x3f   :  { %324 = vmatmul.f32.gmra.mxu1 %v225_v22 }
  0x43   :  { %259 = vmatmul.f32.gmra.mxu0 %v225_v22 }
  0x45   :  { %283 = vmatmul.f32.gmra.mxu2 %v233_v19 }
  0x46   :  { %348 = vmatmul.f32.gmra.mxu3 %v233_v19 }
  0x47   :  { %327 = vmatmul.f32.gmra.mxu1 %v226_v20 }
  0x4b   :  { %262 = vmatmul.f32.gmra.mxu0 %v226_v20 }
  0x4d   :  { %286 = vmatmul.f32.gmra.mxu2 %v234_v49 }
  0x4e   :  { %351 = vmatmul.f32.gmra.mxu3 %v234_v49 }
  0x4f   :  { %330 = vmatmul.f32.gmra.mxu1 %v227_v21 }
  0x53   :  { %265 = vmatmul.f32.gmra.mxu0 %v227_v21 }
  0x55   :  { %289 = vmatmul.f32.gmra.mxu2 %v235_v50 }
  0x56   :  { %354 = vmatmul.f32.gmra.mxu3 %v235_v50 }
  0x57   :  { %333 = vmatmul.f32.gmra.mxu1 %v228_v51 }
  0x5b   :  { %268 = vmatmul.f32.gmra.mxu0 %v228_v51 }
  0x5d   :  { %292 = vmatmul.f32.gmra.mxu2 %v236_v1 }
  0x5e   :  { %357 = vmatmul.f32.gmra.mxu3 %v236_v1 }
  0x5f   :  { %336 = vmatmul.f32.gmra.mxu1 %v229_v17 }
  0x63   :  { %271 = vmatmul.f32.gmra.mxu0 %v229_v17 }
  0x65   :  { %295 = vmatmul.f32.gmra.mxu2 %v237_v26 }
  0x66   :  { %360 = vmatmul.f32.gmra.mxu3 %v237_v26 }
  0x67   :  { %339 = vmatmul.f32.gmra.mxu1 %v230_v52 }
  0x6b   :  { %274 = vmatmul.f32.gmra.mxu0 %v230_v52 }
  0x6d   :  { %298 = vmatmul.f32.gmra.mxu2 %v238_v53 }
  0x6e   :  { %363 = vmatmul.f32.gmra.mxu3 %v238_v53 }
  0x6f   :  { %342 = vmatmul.f32.gmra.mxu1 %v231_v54 }
  0x73   :  { %277 = vmatmul.f32.gmra.mxu0 %v231_v54 }
  0x75   :  { %301 = vmatmul.f32.gmra.mxu2 %v239_v55 }
  0x76   :  { %366 = vmatmul.f32.gmra.mxu3 %v239_v55 }
  0xb4   :  { %v322_v56 = vpop.f32.mrf.mxu1 }
  0xb8   :  { %v257_v57 = vpop.f32.mrf.mxu0 }
  0xb9   :  { %v370_v30 = vmul.f32 %v322_v56, %v257_v57 }
  0xbc   :  { %v325_v58 = vpop.f32.mrf.mxu1 }
  0xc0   :  { %v260_v59 = vpop.f32.mrf.mxu0  ;;  %v281_v60 = vpop.f32.mrf.mxu2 }
  0xc1   :  { %v346_v61 = vpop.f32.mrf.mxu3  ;;  %v371_v29 = vmul.f32 %v325_v58, %v260_v59 }
  0xc2   :  { %v378_v13 = vmul.f32 %v346_v61, %v281_v60 }
  0xc3   :  { %v386_v32 = vadd.f32 %v371_v29, %v370_v30 }
  0xc4   :  { %v328_v62 = vpop.f32.mrf.mxu1 }
  0xc8   :  { %v263_v63 = vpop.f32.mrf.mxu0  ;;  %v284_v0 = vpop.f32.mrf.mxu2 }
  0xc9   :  { %v349_v2 = vpop.f32.mrf.mxu3  ;;  %v372_v31 = vmul.f32 %v328_v62, %v263_v63 }
  0xca   :  { %v379_v15 = vmul.f32 %v349_v2, %v284_v0 }
  0xcb   :  { %v387_v35 = vadd.f32 %v386_v32, %v372_v31 }
  0xcc   :  { %v331_v3 = vpop.f32.mrf.mxu1 }
  0xd0   :  { %v266_v4 = vpop.f32.mrf.mxu0  ;;  %v287_v5 = vpop.f32.mrf.mxu2 }
  0xd1   :  { %v352_v6 = vpop.f32.mrf.mxu3  ;;  %v373_v33 = vmul.f32 %v331_v3, %v266_v4 }
  0xd2   :  { %v380_v16 = vmul.f32 %v352_v6, %v287_v5 }
  0xd3   :  { %v388_v38 = vadd.f32 %v387_v35, %v373_v33 }
  0xd4   :  { %v334_v7 = vpop.f32.mrf.mxu1 }
  0xd8   :  { %v269_v9 = vpop.f32.mrf.mxu0  ;;  %v290_v23 = vpop.f32.mrf.mxu2 }
  0xd9   :  { %v355_v8 = vpop.f32.mrf.mxu3  ;;  %v374_v36 = vmul.f32 %v334_v7, %v269_v9 }
  0xda   :  { %v381_v22 = vmul.f32 %v355_v8, %v290_v23 }
  0xdb   :  { %v389_v40 = vadd.f32 %v388_v38, %v374_v36 }
  0xdc   :  { %v337_v24 = vpop.f32.mrf.mxu1 }
  0xe0   :  { %v272_v25 = vpop.f32.mrf.mxu0  ;;  %v293_v27 = vpop.f32.mrf.mxu2 }
  0xe1   :  { %v358_v28 = vpop.f32.mrf.mxu3  ;;  %v375_v39 = vmul.f32 %v337_v24, %v272_v25 }
  0xe2   :  { %v382_v20 = vmul.f32 %v358_v28, %v293_v27 }
  0xe3   :  { %v390_v42 = vadd.f32 %v389_v40, %v375_v39 }
  0xe4   :  { %v340_v10 = vpop.f32.mrf.mxu1 }
  0xe8   :  { %v275_v34 = vpop.f32.mrf.mxu0  ;;  %v296_v37 = vpop.f32.mrf.mxu2 }
  0xe9   :  { %v361_v11 = vpop.f32.mrf.mxu3  ;;  %v376_v41 = vmul.f32 %v340_v10, %v275_v34 }
  0xea   :  { %v383_v51 = vmul.f32 %v361_v11, %v296_v37 }
  0xeb   :  { %v391_v44 = vadd.f32 %v390_v42, %v376_v41 }
  0xec   :  { %v343_v12 = vpop.f32.mrf.mxu1 }
  0xf0   :  { %v278_v43 = vpop.f32.mrf.mxu0  ;;  %v299_v46 = vpop.f32.mrf.mxu2 }
  0xf1   :  { %v377_v45 = vmul.f32 %v343_v12, %v278_v43  ;;  %v364_v47 = vpop.f32.mrf.mxu3 }
  0xf2   :  { %v384_v26 = vmul.f32 %v364_v47, %v299_v46 }
  0xf3   :  { %v392_v14 = vadd.f32 %v391_v44, %v377_v45 }
  0xf5   :  { %v393_v48 = vadd.f32 %v392_v14, %v378_v13 }
  0xf7   :  { %v394_v18 = vadd.f32 %v393_v48, %v379_v15 }
  0xf8   :  { %v302_v21 = vpop.f32.mrf.mxu2 }
  0xf9   :  { %v395_v19 = vadd.f32 %v394_v18, %v380_v16  ;;  %v367_v50 = vpop.f32.mrf.mxu3 }
  0xfa   :  { %v385_v52 = vmul.f32 %v367_v50, %v302_v21 }
  0xfb   :  { %v396_v49 = vadd.f32 %v395_v19, %v381_v22 }
  0xfd   :  { %v397_v1 = vadd.f32 %v396_v49, %v382_v20 }
  0xff   :  { %v398_v17 = vadd.f32 %v397_v1, %v383_v51 }
 0x101   :  { %v399_v53 = vadd.f32 %v398_v17, %v384_v26 }
 0x103   :  { %v400_v54 = vadd.f32 %v399_v53, %v385_v52 }
 0x105   :  { %v401_v55 = vrot.slane %v400_v54, 4 }
 0x107   :  { %v402_v56 = vadd.f32 %v401_v55, %v400_v54 }
 0x109   :  { %v403_v57 = vrot.slane %v402_v56, 2 }
 0x10b   :  { %v404_v58 = vadd.f32 %v403_v57, %v402_v56 }
 0x10d   :  { %v405_v59 = vrot.slane %v404_v58, 1 }
 0x10f   :  { %v406_v60 = vadd.f32 %v405_v59, %v404_v58 }
 0x111   :  { %407 = vst [vmem:[#allocation7] sm:$0x1] %v406_v60 }
 0x112   :  { %418 = dma.vmem_to_hbm [thread:$0]  %s414_s1, 16, %s416_s23, [#allocation4]  }
 0x113   :  { %557 = dma.done.wait [#allocation4], 16  }
 0x114   :  { %558 = vsyncadd [#allocation4], 4294967280 }
 0x115   :  { %423 = vsyncpa [#allocation3], 1 }
 0x116   :  { %424 = vsyncpa [#allocation6], 1 }
 0x117   :  { %425 = vsyncpa [#allocation4], 1 }

</bundles_post_ra>
